<compile_context>
chip_gen: v7x
topology: tpu7x:2x2x1
jax: 0.10.0
libtpu: 0.0.40
codegen_flags: <defaults>
</compile_context>

<pallas_src>
import jax
import jax.numpy as jnp
from jax.experimental import pallas as pl
from jax.experimental.pallas import tpu as pltpu


def mip_head_kernel(x1_ref, m1_ref, x2_ref, m2_ref, w2_ref, w1_ref, b_ref,
                    inv_ref, o_ref, acc1_ref, acc2_ref):
    """One (batch-tile, seq-tile) grid step of the MIP classification head."""
    k = pl.program_id(1)

    @pl.when(k == 0)
    def _init():
        acc1_ref[...] = jnp.zeros_like(acc1_ref)
        acc2_ref[...] = jnp.zeros_like(acc2_ref)

    # Masked-pooling contribution of this sequence tile, on the MXU:
    #   acc[b, 0, h] += sum_s m[b, 0, s] * x[b, s, h]
    # Streams stay in the encoder's native dtype (bf16); accumulation is f32.
    acc1_ref[...] += jnp.einsum('bqs,bsh->bqh', m1_ref[...], x1_ref[...],
                                preferred_element_type=jnp.float32)
    acc2_ref[...] += jnp.einsum('bqs,bsh->bqh', m2_ref[...], x2_ref[...],
                                preferred_element_type=jnp.float32)

    # Classifier + log-softmax only once per batch tile (last reduction step).
    @pl.when(k == pl.num_programs(1) - 1)
    def _finalize():
        pooled1 = acc1_ref[...][:, 0, :] * inv_ref[0, 0]   # target_output   / target_mask.sum()
        pooled2 = acc2_ref[...][:, 0, :] * inv_ref[0, 1]   # target_output_2 / target_mask_2.sum()
        # cat([pooled_2, pooled_1]) @ W + b, weight halves stored lane-dense [L, H]:
        #   == pooled_2 @ W[:H] + pooled_1 @ W[H:] + b
        logits = (jnp.einsum('bh,lh->bl', pooled2, w2_ref[...],
                             preferred_element_type=jnp.float32)
                  + jnp.einsum('bh,lh->bl', pooled1, w1_ref[...],
                               preferred_element_type=jnp.float32)
                  + b_ref[...])                            # [tb, L]
        mx = jnp.max(logits, axis=-1, keepdims=True)
        sh = logits - mx
        lse = jnp.log(jnp.sum(jnp.exp(sh), axis=-1, keepdims=True))
        o_ref[...] = (sh - lse).astype(o_ref.dtype)


def _vmem_capacity_bytes():
    """Physical VMEM per core (128 MiB v5e/v6e, 64 MiB per TC on v7x)."""
    try:
        cap = getattr(pltpu.get_tpu_info(), "vmem_capacity_bytes", None)
        if cap:
            return int(cap)
    except Exception:
        pass
    return 64 * 1024 * 1024        # conservative fallback (v7x per-TensorCore)


def _pad(x, m):
    return -(-x // m) * m


def _choose_tiles(B, S, H, itemsize, stream_budget, target_step_bytes,
                  tb=None, ts=None):
    """Pick (tb, ts) under the constraints:
       - ts is a multiple of 128 (lane-dense mask blocks) or ts == S,
       - tb is a multiple of 8 (sublane-aligned blocks) or tb == B,
       - prefer B // tb >= 2 so the parallel batch axis spans both v7x TCs,
       - grow tb first, then grow ts until the per-grid-step streamed bytes
         cover the ~0.35us pipeline overhead, within the VMEM stream budget."""
    Hp = _pad(H, 128)

    def fits(tb_, ts_):
        seq = 2 * 2 * tb_ * _pad(ts_, 16) * Hp * itemsize   # 2 streams, double-buffered
        msk = 2 * 2 * tb_ * 8 * _pad(ts_, 128) * itemsize   # [tb,1,ts] pads sublane 1->8
        acc = 2 * tb_ * 8 * Hp * 4                          # f32 accumulators
        return seq + msk + acc <= stream_budget

    if ts is not None:
        ts_cands = [ts]
    else:
        ts_cands = sorted({d for d in range(128, S, 128) if S % d == 0} | {S})
    if tb is not None:
        tb_cands = [tb]
    else:
        multi = [d for d in range(8, B, 8) if B % d == 0 and B // d >= 2]
        tb_cands = sorted(multi) if multi else [B]

    tb_sel = max([t for t in tb_cands if fits(t, ts_cands[0])] or [tb_cands[0]])
    fitting = [t for t in ts_cands if fits(tb_sel, t)] or [ts_cands[0]]
    meeting = [t for t in fitting
               if 2 * tb_sel * t * H * itemsize >= target_step_bytes]
    ts_sel = min(meeting) if meeting else max(fitting)
    return tb_sel, ts_sel


def mip_head(seq_out_1, target_mask_1, seq_out_2, target_mask_2,
             weight_2h_l, bias_l, *, tb=None, ts=None, seq_buffers=2):
    """Pallas wrapper for the MIP head.  weight_2h_l is [2H, L] (PyTorch W.T)."""
    B, S, H = seq_out_1.shape
    L = weight_2h_l.shape[1]
    assert weight_2h_l.shape[0] == 2 * H
    x_dtype = seq_out_1.dtype
    itemsize = jnp.dtype(x_dtype).itemsize

    # Generation-aware VMEM sizing: ~100 MiB usable on v5e/v6e (128 MiB phys),
    # ~50 MiB on v7x (64 MiB per TensorCore).
    cap = _vmem_capacity_bytes()
    vmem_limit = max(16 << 20, min(int(cap * 0.8), cap - (8 << 20)))
    fixed = 2 * 2 * L * _pad(H, 128) * 4 + (2 << 20)     # weights + bias/out/slack
    stream_budget = max(4 << 20, vmem_limit - fixed)
    # per-grid-step streamed-byte target vs ~0.35us step overhead (HBM BW scaled)
    target_step = (8 << 20) if cap <= (64 << 20) else (4 << 20)
    tb, ts = _choose_tiles(B, S, H, itemsize, stream_budget, target_step, tb, ts)
    assert B % tb == 0 and S % ts == 0

    # Global mask sums (one scalar per input, shared by the whole batch — this
    # matches the quirky PyTorch `target_mask.sum()`).  eps guards an all-zero
    # mask, which would produce NaN/Inf in the reference module.
    m1f = target_mask_1.astype(jnp.float32)
    m2f = target_mask_2.astype(jnp.float32)
    inv = jnp.stack([1.0 / jnp.maximum(m1f.sum(), 1e-6),
                     1.0 / jnp.maximum(m2f.sum(), 1e-6)]).reshape(1, 2)

    # Masks as [B, 1, S] in the sequence dtype (0/1 exact in bf16): the lane
    # axis is S, so the in-kernel contraction feeds the MXU and mask blocks
    # only pad sublane 1->8 (vs 128x lane padding of a [tb, ts, 1] layout).
    m1_b1s = target_mask_1.astype(x_dtype).reshape(B, 1, S)
    m2_b1s = target_mask_2.astype(x_dtype).reshape(B, 1, S)

    # Classifier weight halves stored lane-dense as [L, H]:
    #   cat([pooled_2, pooled_1]) @ W + b == pooled_2 @ W[:H] + pooled_1 @ W[H:] + b
    w2 = weight_2h_l[:H].T.astype(jnp.float32)      # [L, H], acts on pooled_2
    w1 = weight_2h_l[H:].T.astype(jnp.float32)      # [L, H], acts on pooled_1
    b2d = bias_l.reshape(1, L).astype(jnp.float32)

    cost = pl.CostEstimate(
        flops=int(2 * 2 * B * S * H            # two masked-pooling contractions
                  + 2 * 2 * B * H * L          # classifier halves
                  + 7 * B * L + 2 * B * H),    # softmax + scaling
        transcendentals=int(B * (L + 1)),
        bytes_accessed=int(2 * B * S * H * itemsize + 2 * B * S * itemsize
                           + 2 * H * L * 4 + L * 4 + B * L * 4),
    )

    grid = (B // tb, S // ts)
    seq_kwargs = {}
    if seq_buffers is not None and seq_buffers != 2:
        # e.g. seq_buffers=3 on v7x if profiling shows exposed DMA on the
        # short, bandwidth-hungry sequence-stream steps.
        seq_kwargs["pipeline_mode"] = pl.Buffered(seq_buffers)
    seq_spec = pl.BlockSpec((tb, ts, H), lambda b, k: (b, k, 0), **seq_kwargs)
    msk_spec = pl.BlockSpec((tb, 1, ts), lambda b, k: (b, 0, k))
    w_spec = pl.BlockSpec((L, H), lambda b, k: (0, 0))
    b_spec = pl.BlockSpec((1, L), lambda b, k: (0, 0))
    inv_spec = pl.BlockSpec((1, 2), lambda b, k: (0, 0),
                            memory_space=pltpu.MemorySpace.SMEM)

    return pl.pallas_call(
        mip_head_kernel,
        out_shape=jax.ShapeDtypeStruct((B, L), jnp.float32),
        grid=grid,
        in_specs=[seq_spec, msk_spec, seq_spec, msk_spec,
                  w_spec, w_spec, b_spec, inv_spec],
        out_specs=pl.BlockSpec((tb, L), lambda b, k: (b, 0)),
        scratch_shapes=[pltpu.VMEM((tb, 1, H), jnp.float32),
                        pltpu.VMEM((tb, 1, H), jnp.float32)],
        compiler_params=pltpu.CompilerParams(
            dimension_semantics=("parallel", "arbitrary"),
            vmem_limit_bytes=vmem_limit),
        cost_estimate=cost,
    )(seq_out_1, m1_b1s, seq_out_2, m2_b1s, w2, w1, b2d, inv)


def reference_mip(seq_out_1, target_mask_1, seq_out_2, target_mask_2,
                  weight_2h_l, bias_l):
    """Plain-JAX reference matching the PyTorch forward (labels=None, eval)."""
    x1 = seq_out_1.astype(jnp.float32)
    x2 = seq_out_2.astype(jnp.float32)
    m1 = target_mask_1.astype(jnp.float32)
    m2 = target_mask_2.astype(jnp.float32)
    t1 = (x1 * m1[:, :, None]).sum(axis=1) / m1.sum()
    t2 = (x2 * m2[:, :, None]).sum(axis=1) / m2.sum()
    logits = jnp.concatenate([t2, t1], axis=1) @ weight_2h_l + bias_l
    return jax.nn.log_softmax(logits, axis=1)


if __name__ == "__main__":
    # Small shapes consistent with the module's forward.
    B, S, H, L, VOCAB = 4, 256, 64, 2, 128
    initializer_range = 0.02

    key = jax.random.PRNGKey(0)
    k_emb, k_ids1, k_ids2, k_m1, k_m2, k_w = jax.random.split(key, 6)

    # TODO(synk): the real BERT encoder (self.encoder = Model) is injected
    # externally in the PyTorch module; a deterministic embedding lookup
    # (bf16 outputs, like a bf16 backbone) stands in for both encoder calls.
    # attention_mask / attention_mask_2 / token_type_ids / head_mask only
    # feed the encoder and are therefore not part of the Pallas head.
    emb_table = jax.random.normal(k_emb, (VOCAB, H), dtype=jnp.float32) * 0.1
    input_ids = jax.random.randint(k_ids1, (B, S), 0, VOCAB)
    input_ids_2 = jax.random.randint(k_ids2, (B, S), 0, VOCAB)
    seq_out_1 = emb_table[input_ids].astype(jnp.bfloat16)     # [B, S, H]
    seq_out_2 = emb_table[input_ids_2].astype(jnp.bfloat16)   # [B, S, H]

    # target masks: 1 for target words, 0 otherwise (ensure at least one 1)
    target_mask = (jax.random.uniform(k_m1, (B, S)) > 0.5).astype(jnp.int32)
    target_mask = target_mask.at[:, 0].set(1)
    target_mask_2 = (jax.random.uniform(k_m2, (B, S)) > 0.5).astype(jnp.int32)
    target_mask_2 = target_mask_2.at[:, 0].set(1)

    # Classifier: nn.Linear(2H, L) -> weight [L, 2H] ~ N(0, 0.02), bias = 0.
    w_l2h = jax.random.normal(k_w, (L, 2 * H), dtype=jnp.float32) * initializer_range
    weight_2h_l = w_l2h.T                                     # [2H, L]
    bias_l = jnp.zeros((L,), dtype=jnp.float32)

    # ts=128 -> two reduction steps along S, exercising the accumulator path.
    logits = mip_head(seq_out_1, target_mask, seq_out_2, target_mask_2,
                      weight_2h_l, bias_l, ts=128)
    logits = jax.block_until_ready(logits)

    ref = reference_mip(seq_out_1, target_mask, seq_out_2, target_mask_2,
                        weight_2h_l, bias_l)
    assert logits.shape == (B, L)
    assert jnp.allclose(logits, ref, atol=1e-5, rtol=1e-5), "mismatch vs reference"

    # Optional labels path (NLLLoss on the Pallas log-probs), done in glue:
    labels = jnp.array([0, 1, 0, 1], dtype=jnp.int32)
    loss = -jnp.mean(logits[jnp.arange(B), labels])
    jax.block_until_ready(loss)

    print("KERNEL_OK")
</pallas_src>

<mosaic_0001>
module attributes {stable_mosaic.version = 11 : i64} {
  func.func @mip_head_kernel(%arg0: i32, %arg1: i32, %arg2: memref<4x128x64xbf16, #tpu.memory_space<vmem>>, %arg3: memref<4x1x128xbf16, #tpu.memory_space<vmem>>, %arg4: memref<4x128x64xbf16, #tpu.memory_space<vmem>>, %arg5: memref<4x1x128xbf16, #tpu.memory_space<vmem>>, %arg6: memref<2x64xf32, #tpu.memory_space<vmem>>, %arg7: memref<2x64xf32, #tpu.memory_space<vmem>>, %arg8: memref<1x2xf32, #tpu.memory_space<vmem>>, %arg9: memref<1x2xf32, #tpu.memory_space<smem>>, %arg10: memref<4x2xf32, #tpu.memory_space<vmem>>, %arg11: memref<4x1x64xf32, #tpu.memory_space<vmem>>, %arg12: memref<4x1x64xf32, #tpu.memory_space<vmem>>) attributes {dimension_semantics = [#tpu.dimension_semantics<parallel>, #tpu.dimension_semantics<arbitrary>], iteration_bounds = array<i64: 1, 2>, scalar_prefetch = 0 : i64, scratch_operands = 2 : i64, tpu.core_type = #tpu.core_type<tc>, window_params = [{transform_indices = @transform_0, window_bounds = array<i64: 4, 128, 64>}, {transform_indices = @transform_1, window_bounds = array<i64: 4, 1, 128>}, {transform_indices = @transform_2, window_bounds = array<i64: 4, 128, 64>}, {transform_indices = @transform_3, window_bounds = array<i64: 4, 1, 128>}, {pipeline_mode = #tpu.pipeline_mode<synchronous>, transform_indices = @transform_4, window_bounds = array<i64: 2, 64>}, {pipeline_mode = #tpu.pipeline_mode<synchronous>, transform_indices = @transform_5, window_bounds = array<i64: 2, 64>}, {pipeline_mode = #tpu.pipeline_mode<synchronous>, transform_indices = @transform_6, window_bounds = array<i64: 1, 2>}, {transform_indices = @transform_7, window_bounds = array<i64: 1, 2>}, {transform_indices = @transform_8, window_bounds = array<i64: 4, 2>}]} {
    %c0_i32 = arith.constant 0 : i32
    %0 = arith.cmpi eq, %arg1, %c0_i32 : i32
    %1 = arith.extui %0 : i1 to i32
    %c0_i32_0 = arith.constant 0 : i32
    %2 = arith.cmpi ne, %1, %c0_i32_0 : i32
    scf.if %2 {
      %cst_26 = arith.constant 0.000000e+00 : f32
      %18 = vector.broadcast %cst_26 : f32 to vector<4x1x64xf32>
      %c0_27 = arith.constant 0 : index
      %c0_28 = arith.constant 0 : index
      %c0_29 = arith.constant 0 : index
      %19 = vector.load %arg11[%c0_27, %c0_28, %c0_29] : memref<4x1x64xf32, #tpu.memory_space<vmem>>, vector<4x1x64xf32>
      tpu.vector_store %arg11[%c0_27, %c0_28, %c0_29], %18 {strides = array<i32>} : memref<4x1x64xf32, #tpu.memory_space<vmem>>, vector<4x1x64xf32>,
      %cst_30 = arith.constant 0.000000e+00 : f32
      %20 = vector.broadcast %cst_30 : f32 to vector<4x1x64xf32>
      %c0_31 = arith.constant 0 : index
      %c0_32 = arith.constant 0 : index
      %c0_33 = arith.constant 0 : index
      %21 = vector.load %arg12[%c0_31, %c0_32, %c0_33] : memref<4x1x64xf32, #tpu.memory_space<vmem>>, vector<4x1x64xf32>
      tpu.vector_store %arg12[%c0_31, %c0_32, %c0_33], %20 {strides = array<i32>} : memref<4x1x64xf32, #tpu.memory_space<vmem>>, vector<4x1x64xf32>,
    } else {
    }
    %c0 = arith.constant 0 : index
    %c0_1 = arith.constant 0 : index
    %c0_2 = arith.constant 0 : index
    %3 = vector.load %arg11[%c0, %c0_1, %c0_2] : memref<4x1x64xf32, #tpu.memory_space<vmem>>, vector<4x1x64xf32>
    %c0_3 = arith.constant 0 : index
    %c0_4 = arith.constant 0 : index
    %c0_5 = arith.constant 0 : index
    %4 = vector.load %arg3[%c0_3, %c0_4, %c0_5] : memref<4x1x128xbf16, #tpu.memory_space<vmem>>, vector<4x1x128xbf16>
    %c0_6 = arith.constant 0 : index
    %c0_7 = arith.constant 0 : index
    %c0_8 = arith.constant 0 : index
    %5 = vector.load %arg2[%c0_6, %c0_7, %c0_8] : memref<4x128x64xbf16, #tpu.memory_space<vmem>>, vector<4x128x64xbf16>
    "tpu.trace_start"() <{level = 10 : i32, message = "bqs,bsh->bqh"}> : () -> ()
    %cst = arith.constant dense<0.000000e+00> : vector<4x1x64xf32>
    %6 = tpu.matmul %4, %5, %cst {dimension_numbers = #tpu.dot_dimension_numbers<[2], [1], [1], [2], [0, 0, 0, 1, 1, 2], [0], [0]>} : vector<4x1x128xbf16>, vector<4x128x64xbf16>, vector<4x1x64xf32> -> vector<4x1x64xf32>
    "tpu.trace_stop"() : () -> ()
    %7 = arith.addf %3, %6 : vector<4x1x64xf32>
    %c0_9 = arith.constant 0 : index
    %c0_10 = arith.constant 0 : index
    %c0_11 = arith.constant 0 : index
    %8 = vector.load %arg11[%c0_9, %c0_10, %c0_11] : memref<4x1x64xf32, #tpu.memory_space<vmem>>, vector<4x1x64xf32>
    tpu.vector_store %arg11[%c0_9, %c0_10, %c0_11], %7 {strides = array<i32>} : memref<4x1x64xf32, #tpu.memory_space<vmem>>, vector<4x1x64xf32>,
    %c0_12 = arith.constant 0 : index
    %c0_13 = arith.constant 0 : index
    %c0_14 = arith.constant 0 : index
    %9 = vector.load %arg12[%c0_12, %c0_13, %c0_14] : memref<4x1x64xf32, #tpu.memory_space<vmem>>, vector<4x1x64xf32>
    %c0_15 = arith.constant 0 : index
    %c0_16 = arith.constant 0 : index
    %c0_17 = arith.constant 0 : index
    %10 = vector.load %arg5[%c0_15, %c0_16, %c0_17] : memref<4x1x128xbf16, #tpu.memory_space<vmem>>, vector<4x1x128xbf16>
    %c0_18 = arith.constant 0 : index
    %c0_19 = arith.constant 0 : index
    %c0_20 = arith.constant 0 : index
    %11 = vector.load %arg4[%c0_18, %c0_19, %c0_20] : memref<4x128x64xbf16, #tpu.memory_space<vmem>>, vector<4x128x64xbf16>
    "tpu.trace_start"() <{level = 10 : i32, message = "bqs,bsh->bqh"}> : () -> ()
    %cst_21 = arith.constant dense<0.000000e+00> : vector<4x1x64xf32>
    %12 = tpu.matmul %10, %11, %cst_21 {dimension_numbers = #tpu.dot_dimension_numbers<[2], [1], [1], [2], [0, 0, 0, 1, 1, 2], [0], [0]>} : vector<4x1x128xbf16>, vector<4x128x64xbf16>, vector<4x1x64xf32> -> vector<4x1x64xf32>
    "tpu.trace_stop"() : () -> ()
    %13 = arith.addf %9, %12 : vector<4x1x64xf32>
    %c0_22 = arith.constant 0 : index
    %c0_23 = arith.constant 0 : index
    %c0_24 = arith.constant 0 : index
    %14 = vector.load %arg12[%c0_22, %c0_23, %c0_24] : memref<4x1x64xf32, #tpu.memory_space<vmem>>, vector<4x1x64xf32>
    tpu.vector_store %arg12[%c0_22, %c0_23, %c0_24], %13 {strides = array<i32>} : memref<4x1x64xf32, #tpu.memory_space<vmem>>, vector<4x1x64xf32>,
    %c1_i32 = arith.constant 1 : i32
    %15 = arith.cmpi eq, %arg1, %c1_i32 : i32
    %16 = arith.extui %15 : i1 to i32
    %c0_i32_25 = arith.constant 0 : i32
    %17 = arith.cmpi ne, %16, %c0_i32_25 : i32
    scf.if %17 {
      %c0_26 = arith.constant 0 : index
      %c0_27 = arith.constant 0 : index
      %c0_28 = arith.constant 0 : index
      %18 = vector.load %arg11[%c0_26, %c0_27, %c0_28] : memref<4x1x64xf32, #tpu.memory_space<vmem>>, vector<4x1x64xf32>
      %19 = vector.shape_cast %18 : vector<4x1x64xf32> to vector<4x64xf32>
      %c0_29 = arith.constant 0 : index
      %c0_30 = arith.constant 0 : index
      %20 = memref.load %arg9[%c0_29, %c0_30] : memref<1x2xf32, #tpu.memory_space<smem>>
      %21 = vector.broadcast %20 : f32 to vector<4x64xf32>
      %22 = arith.mulf %19, %21 : vector<4x64xf32>
      %c0_31 = arith.constant 0 : index
      %c0_32 = arith.constant 0 : index
      %c0_33 = arith.constant 0 : index
      %23 = vector.load %arg12[%c0_31, %c0_32, %c0_33] : memref<4x1x64xf32, #tpu.memory_space<vmem>>, vector<4x1x64xf32>
      %24 = vector.shape_cast %23 : vector<4x1x64xf32> to vector<4x64xf32>
      %c0_34 = arith.constant 0 : index
      %c1 = arith.constant 1 : index
      %25 = memref.load %arg9[%c0_34, %c1] : memref<1x2xf32, #tpu.memory_space<smem>>
      %26 = vector.broadcast %25 : f32 to vector<4x64xf32>
      %27 = arith.mulf %24, %26 : vector<4x64xf32>
      %c0_35 = arith.constant 0 : index
      %c0_36 = arith.constant 0 : index
      %28 = vector.load %arg6[%c0_35, %c0_36] : memref<2x64xf32, #tpu.memory_space<vmem>>, vector<2x64xf32>
      "tpu.trace_start"() <{level = 10 : i32, message = "bh,lh->bl"}> : () -> ()
      %cst_37 = arith.constant dense<0.000000e+00> : vector<4x2xf32>
      %29 = tpu.matmul %27, %28, %cst_37 {dimension_numbers = #tpu.dot_dimension_numbers<[1], [1], [0], [0], [0, 0, 1, 0], [], []>} : vector<4x64xf32>, vector<2x64xf32>, vector<4x2xf32> -> vector<4x2xf32>
      "tpu.trace_stop"() : () -> ()
      %c0_38 = arith.constant 0 : index
      %c0_39 = arith.constant 0 : index
      %30 = vector.load %arg7[%c0_38, %c0_39] : memref<2x64xf32, #tpu.memory_space<vmem>>, vector<2x64xf32>
      "tpu.trace_start"() <{level = 10 : i32, message = "bh,lh->bl"}> : () -> ()
      %cst_40 = arith.constant dense<0.000000e+00> : vector<4x2xf32>
      %31 = tpu.matmul %22, %30, %cst_40 {dimension_numbers = #tpu.dot_dimension_numbers<[1], [1], [0], [0], [0, 0, 1, 0], [], []>} : vector<4x64xf32>, vector<2x64xf32>, vector<4x2xf32> -> vector<4x2xf32>
      "tpu.trace_stop"() : () -> ()
      %32 = arith.addf %29, %31 : vector<4x2xf32>
      %c0_41 = arith.constant 0 : index
      %c0_42 = arith.constant 0 : index
      %33 = vector.load %arg8[%c0_41, %c0_42] : memref<1x2xf32, #tpu.memory_space<vmem>>, vector<1x2xf32>
      %34 = vector.broadcast %33 : vector<1x2xf32> to vector<4x2xf32>
      %35 = arith.addf %32, %34 : vector<4x2xf32>
      %cst_43 = arith.constant dense<0xFF800000> : vector<4xf32>
      %36 = vector.multi_reduction <maximumf>, %35, %cst_43 [1] : vector<4x2xf32> to vector<4xf32>
      %37 = vector.shape_cast %36 : vector<4xf32> to vector<4x1xf32>
      %38 = vector.broadcast %37 : vector<4x1xf32> to vector<4x2xf32>
      %39 = arith.subf %35, %38 : vector<4x2xf32>
      %40 = math.exp %39 : vector<4x2xf32>
      %cst_44 = arith.constant dense<0.000000e+00> : vector<4xf32>
      %41 = vector.multi_reduction <add>, %40, %cst_44 [1] : vector<4x2xf32> to vector<4xf32>
      %42 = vector.shape_cast %41 : vector<4xf32> to vector<4x1xf32>
      %43 = math.log %42 : vector<4x1xf32>
      %44 = vector.broadcast %43 : vector<4x1xf32> to vector<4x2xf32>
      %45 = arith.subf %39, %44 : vector<4x2xf32>
      %c0_45 = arith.constant 0 : index
      %c0_46 = arith.constant 0 : index
      %46 = vector.load %arg10[%c0_45, %c0_46] : memref<4x2xf32, #tpu.memory_space<vmem>>, vector<4x2xf32>
      tpu.vector_store %arg10[%c0_45, %c0_46], %45 {strides = array<i32>} : memref<4x2xf32, #tpu.memory_space<vmem>>, vector<4x2xf32>,
    } else {
    }
    return
  }
  func.func @transform_0(%arg0: i32, %arg1: i32) -> (i32, i32, i32) {
    %c0_i32 = arith.constant 0 : i32
    %c0_i32_0 = arith.constant 0 : i32
    return %arg0, %arg1, %c0_i32 : i32, i32, i32
  }
  func.func @transform_1(%arg0: i32, %arg1: i32) -> (i32, i32, i32) {
    %c0_i32 = arith.constant 0 : i32
    %c0_i32_0 = arith.constant 0 : i32
    return %arg0, %c0_i32, %arg1 : i32, i32, i32
  }
  func.func @transform_2(%arg0: i32, %arg1: i32) -> (i32, i32, i32) {
    %c0_i32 = arith.constant 0 : i32
    %c0_i32_0 = arith.constant 0 : i32
    return %arg0, %arg1, %c0_i32 : i32, i32, i32
  }
  func.func @transform_3(%arg0: i32, %arg1: i32) -> (i32, i32, i32) {
    %c0_i32 = arith.constant 0 : i32
    %c0_i32_0 = arith.constant 0 : i32
    return %arg0, %c0_i32, %arg1 : i32, i32, i32
  }
  func.func @transform_4(%arg0: i32, %arg1: i32) -> (i32, i32) {
    %c0_i32 = arith.constant 0 : i32
    %c0_i32_0 = arith.constant 0 : i32
    %c0_i32_1 = arith.constant 0 : i32
    return %c0_i32, %c0_i32_0 : i32, i32
  }
  func.func @transform_5(%arg0: i32, %arg1: i32) -> (i32, i32) {
    %c0_i32 = arith.constant 0 : i32
    %c0_i32_0 = arith.constant 0 : i32
    %c0_i32_1 = arith.constant 0 : i32
    return %c0_i32, %c0_i32_0 : i32, i32
  }
  func.func @transform_6(%arg0: i32, %arg1: i32) -> (i32, i32) {
    %c0_i32 = arith.constant 0 : i32
    %c0_i32_0 = arith.constant 0 : i32
    %c0_i32_1 = arith.constant 0 : i32
    return %c0_i32, %c0_i32_0 : i32, i32
  }
  func.func @transform_7(%arg0: i32, %arg1: i32) -> (i32, i32) {
    %c0_i32 = arith.constant 0 : i32
    %c0_i32_0 = arith.constant 0 : i32
    %c0_i32_1 = arith.constant 0 : i32
    return %c0_i32, %c0_i32_0 : i32, i32
  }
  func.func @transform_8(%arg0: i32, %arg1: i32) -> (i32, i32) {
    %c0_i32 = arith.constant 0 : i32
    %c0_i32_0 = arith.constant 0 : i32
    return %arg0, %c0_i32 : i32, i32
  }
}

</mosaic_0001>

<bundles_post_ra>
// kernel: tpu_custom_call.1
= control target key start
LH: loop header
LB: loop body
LE: loop exit
PB: predicated region body
PF: predicated region fallthrough
CT: control target
= control target key end

     0   :  { %13 = vsyncpa [#allocation9], 0  ;;  %s2942_s27 = smov 0   ;;  %s2944_s28 = smov 0   ;;  %s3377_s0 = inlined_call_operand.vmem [shape: bf16[4,256,64], index: 0, kind: input, shape index: {}]   ;;  %s3378_s1 = inlined_call_operand.vmem [shape: bf16[4,1,256], index: 1, kind: input, shape index: {}]   ;;  %s3379_s2 = inlined_call_operand.vmem [shape: bf16[4,256,64], index: 2, kind: input, shape index: {}]   ;;  %s3380_s3 = inlined_call_operand.vmem [shape: bf16[4,1,256], index: 3, kind: input, shape index: {}]   ;;  %s3381_s4 = inlined_call_operand.vmem [shape: f32[2,64], index: 4, kind: input, shape index: {}]   ;;  %s3382_s5 = inlined_call_operand.vmem [shape: f32[2,64], index: 5, kind: input, shape index: {}]   ;;  %s3383_s6 = inlined_call_operand.vmem [shape: f32[1,2], index: 6, kind: input, shape index: {}]   ;;  %s3384_s7 = inlined_call_operand.vmem [shape: f32[1,2], index: 7, kind: input, shape index: {}]   ;;  %s3385_s8 = inlined_call_operand.vmem [shape: f32[4,2], index: 8, kind: output, shape index: {}]  }
   0x1   :  { %s2946_s29 = smov 0   ;;  %s2948_s30 = smov 0  }
   0x2   :  { %s2950_s9 = smov 0  }
   0x3 LB: > { %s2365_s10 = sadd.s32 4294967295, %s2888_s9   ;;  %s28_s11 = sadd.s32 1, %s2884_s30  ;;  %s2888_s9 = sphi %s2950_s9, %s19_s9   ;;  %s2884_s30 = sphi %s2948_s30, %s3392_s30   ;;  %s2880_s29 = sphi %s2946_s29, %s3391_s29   ;;  %s2876_s28 = sphi %s2944_s28, %s3390_s28   ;;  %s2872_s27 = sphi %s2942_s27, %s3389_s27  }
   0x4   : > { %p29_p0 = scmp.ge.s32.totalorder %s28_s11, 2  ;;  %s40_s12 = sadd.s32 1, %s2876_s28 }
   0x5   : > { %p47_p1 = scmp.ne.s32.totalorder %s2876_s28, %s2872_s27  ;;  %p48_p2 = scmp.eq.s32.totalorder %s2888_s9, 0 }
   0x6   : > { %s3394_s11 = smov (%p29_p0, %s28_s11), 0  ;;  %p2366_p4 = scmp.ge.s32.totalorder %s2888_s9, 1 }
   0x7   : > { %p2975_p3 = por %p48_p2, %p47_p1  ;;  %s36_s14 = ssub.s32 %s2884_s30, %s3394_s11 }
   0x8   : > { %p258_p5 = scmp.lt.s32.totalorder %s2888_s9, 3  ;;  %p38_p6 = scmp.eq.s32.totalorder %s36_s14, 0 }
   0x9   : > { %p2987_p8 = scmp.eq.s32.totalorder %s2365_s10, 0  ;;  %s280_s20 = sshll.u32 %s3384_s7, 4  ;;  %s281_s20 = int_to_ptr.vmem [resolvable:$true] %s280_s20 }
   0xa   : > { %p2983_p7 = pnand %p2366_p4, %p258_p5  ;;  %s2831_s21 = scalar_lea.vmem %s281_s20, 16 }
   0xb   : > { %s2992_s17 = scalar_select %p38_p6, %s2876_s28, %s40_s12  }
   0xc   : > { %p2710_p9 = pneg %p2983_p7  ;;  %p2832_p11 = scmp.ne.s32.totalorder %s281_s20, %s2831_s21 }
   0xd   : > { %p2839_p1 = scmp.lt.s32.totalorder %s281_s20, %s281_s20  ;;  %p2840_p2 = scmp.lt.s32.totalorder %s2831_s21, %s2831_s21 }
   0xe   : > { %p2711_p10 = pnand %p2987_p8, %p2710_p9 }
   0xf   : > { %p2841_p4 = por %p2840_p2, %p2839_p1 }
  0x10   : > { %p2833_p12 = pneg %p2711_p10 }
  0x12   : > { %p2834_p13 = pnand %p2833_p12, %p2832_p11 }
  0x14   : > { %p2835_p0 = pneg %p2834_p13 }
  0x16   : > { %p2842_p5 = pnand %p2841_p4, %p2835_p0 }
  0x18   : > { %2845 = shalt.err (!%p2842_p5)
}
  0x19   : > { %s2890_s22 = smov [#allocation8]   ;;  %p2368_p6 = scmp.ge.s32.totalorder %s2888_s9, 2 }
  0x1a   : > { %2713 = dma.vmem_to_smem (!%p2711_p10), %s281_s20, 16, %s2890_s22, [#allocation9]  }
  0x1b   : > { %287 = sbr.rel (%p2368_p6) target bundleno = 88 (0x58), region = 32 }
  0x22   : > { %290 = sbr.rel (!%p2975_p3) target bundleno = 54 (0x36), region = 36  ;;  %s292_s23 = sand.u32 (%p2975_p3), 1, %s2876_s28  }
  0x23   : > { %s2458_s24 = sshll.u32 (%p2975_p3), %s2884_s30, 6  ;;  %s2369_s25 = sshll.u32 (%p2975_p3), %s292_s23, 8 }
  0x24   : > { %s3009_s12 = scalar_lea.vmem (%p2975_p3), %s3377_s0, %s2458_s24  ;;  %s3014_s14 = scalar_lea.vmem (%p2975_p3), [#allocation4], %s2369_s25 }
  0x25   : > { %v316_v0 = vld [vmem:[%s3009_s12] sm:$0xff] (%p2975_p3)   ;;  %v320_v1 = vld [vmem:[%s3009_s12 + $0x8] sm:$0xff] (%p2975_p3)   ;;  %v324_v2 = vld [vmem:[%s3009_s12 + $0x10] sm:$0xff] (%p2975_p3)  }
  0x26   : > { %317 = vst [vmem:[%s3014_s14] sm:$0xff] (%p2975_p3), %v316_v0   ;;  %321 = vst [vmem:[%s3014_s14 + $0x8] sm:$0xff] (%p2975_p3), %v320_v1   ;;  %v328_v3 = vld [vmem:[%s3009_s12 + $0x18] sm:$0xff] (%p2975_p3)   ;;  %v332_v4 = vld [vmem:[%s3009_s12 + $0x20] sm:$0xff] (%p2975_p3)  }
  0x27   : > { %325 = vst [vmem:[%s3014_s14 + $0x10] sm:$0xff] (%p2975_p3), %v324_v2   ;;  %v336_v5 = vld [vmem:[%s3009_s12 + $0x28] sm:$0xff] (%p2975_p3)   ;;  %329 = vst [vmem:[%s3014_s14 + $0x18] sm:$0xff] (%p2975_p3), %v328_v3   ;;  %v340_v6 = vld [vmem:[%s3009_s12 + $0x30] sm:$0xff] (%p2975_p3)  }
  0x28   : > { %333 = vst [vmem:[%s3014_s14 + $0x20] sm:$0xff] (%p2975_p3), %v332_v4   ;;  %337 = vst [vmem:[%s3014_s14 + $0x28] sm:$0xff] (%p2975_p3), %v336_v5   ;;  %v344_v7 = vld [vmem:[%s3009_s12 + $0x38] sm:$0xff] (%p2975_p3)   ;;  %v348_v8 = vld [vmem:[%s3009_s12 + $0x80] sm:$0xff] (%p2975_p3)  }
  0x29   : > { %341 = vst [vmem:[%s3014_s14 + $0x30] sm:$0xff] %v340_v6   ;;  %345 = vst [vmem:[%s3014_s14 + $0x38] sm:$0xff] %v344_v7   ;;  %v352_v9 = vld [vmem:[%s3009_s12 + $0x88] sm:$0xff]   ;;  %v356_v10 = vld [vmem:[%s3009_s12 + $0x90] sm:$0xff]  }
  0x2a   : > { %349 = vst [vmem:[%s3014_s14 + $0x40] sm:$0xff] %v348_v8   ;;  %v360_v11 = vld [vmem:[%s3009_s12 + $0x98] sm:$0xff]   ;;  %353 = vst [vmem:[%s3014_s14 + $0x48] sm:$0xff] %v352_v9   ;;  %v364_v12 = vld [vmem:[%s3009_s12 + $0xa0] sm:$0xff]  }
  0x2b   : > { %357 = vst [vmem:[%s3014_s14 + $0x50] sm:$0xff] %v356_v10   ;;  %361 = vst [vmem:[%s3014_s14 + $0x58] sm:$0xff] %v360_v11   ;;  %v368_v13 = vld [vmem:[%s3009_s12 + $0xa8] sm:$0xff]   ;;  %v372_v14 = vld [vmem:[%s3009_s12 + $0xb0] sm:$0xff]  }
  0x2c   : > { %365 = vst [vmem:[%s3014_s14 + $0x60] sm:$0xff] %v364_v12   ;;  %369 = vst [vmem:[%s3014_s14 + $0x68] sm:$0xff] %v368_v13   ;;  %v376_v15 = vld [vmem:[%s3009_s12 + $0xb8] sm:$0xff]   ;;  %v380_v16 = vld [vmem:[%s3009_s12 + $0x100] sm:$0xff]  }
  0x2d   : > { %373 = vst [vmem:[%s3014_s14 + $0x70] sm:$0xff] %v372_v14   ;;  %v384_v17 = vld [vmem:[%s3009_s12 + $0x108] sm:$0xff]   ;;  %377 = vst [vmem:[%s3014_s14 + $0x78] sm:$0xff] %v376_v15   ;;  %v388_v18 = vld [vmem:[%s3009_s12 + $0x110] sm:$0xff]  }
  0x2e   : > { %381 = vst [vmem:[%s3014_s14 + $0x80] sm:$0xff] %v380_v16   ;;  %385 = vst [vmem:[%s3014_s14 + $0x88] sm:$0xff] %v384_v17   ;;  %v392_v19 = vld [vmem:[%s3009_s12 + $0x118] sm:$0xff]   ;;  %v396_v20 = vld [vmem:[%s3009_s12 + $0x120] sm:$0xff]  }
  0x2f   : > { %389 = vst [vmem:[%s3014_s14 + $0x90] sm:$0xff] %v388_v18   ;;  %393 = vst [vmem:[%s3014_s14 + $0x98] sm:$0xff] %v392_v19   ;;  %v400_v21 = vld [vmem:[%s3009_s12 + $0x128] sm:$0xff]   ;;  %v404_v22 = vld [vmem:[%s3009_s12 + $0x130] sm:$0xff]  }
  0x30   : > { %397 = vst [vmem:[%s3014_s14 + $0xa0] sm:$0xff] %v396_v20   ;;  %v408_v23 = vld [vmem:[%s3009_s12 + $0x138] sm:$0xff]   ;;  %401 = vst [vmem:[%s3014_s14 + $0xa8] sm:$0xff] %v400_v21   ;;  %v412_v24 = vld [vmem:[%s3009_s12 + $0x180] sm:$0xff]  }
  0x31   : > { %405 = vst [vmem:[%s3014_s14 + $0xb0] sm:$0xff] %v404_v22   ;;  %409 = vst [vmem:[%s3014_s14 + $0xb8] sm:$0xff] %v408_v23   ;;  %v416_v25 = vld [vmem:[%s3009_s12 + $0x188] sm:$0xff]   ;;  %v420_v26 = vld [vmem:[%s3009_s12 + $0x190] sm:$0xff]  }
  0x32   : > { %413 = vst [vmem:[%s3014_s14 + $0xc0] sm:$0xff] %v412_v24   ;;  %417 = vst [vmem:[%s3014_s14 + $0xc8] sm:$0xff] %v416_v25   ;;  %v424_v27 = vld [vmem:[%s3009_s12 + $0x198] sm:$0xff]   ;;  %v428_v28 = vld [vmem:[%s3009_s12 + $0x1a0] sm:$0xff]  }
  0x33   : > { %421 = vst [vmem:[%s3014_s14 + $0xd0] sm:$0xff] %v420_v26   ;;  %v432_v29 = vld [vmem:[%s3009_s12 + $0x1a8] sm:$0xff]   ;;  %425 = vst [vmem:[%s3014_s14 + $0xd8] sm:$0xff] %v424_v27   ;;  %v436_v30 = vld [vmem:[%s3009_s12 + $0x1b0] sm:$0xff]  }
  0x34   : > { %429 = vst [vmem:[%s3014_s14 + $0xe0] sm:$0xff] %v428_v28   ;;  %433 = vst [vmem:[%s3014_s14 + $0xe8] sm:$0xff] %v432_v29   ;;  %v440_v31 = vld [vmem:[%s3009_s12 + $0x1b8] sm:$0xff]  }
  0x35   : > { %437 = vst [vmem:[%s3014_s14 + $0xf0] sm:$0xff] %v436_v30   ;;  %441 = vst [vmem:[%s3014_s14 + $0xf8] sm:$0xff] %v440_v31  }
  0x36 PF: > { %594 = sbr.rel (!%p2975_p3) target bundleno = 61 (0x3d), region = 77  ;;  %s596_s18 = sand.u32 (%p2975_p3), 1, %s2876_s28  }
  0x37   : > { %s602_s21 = scalar_lea.vmem (%p2975_p3), %s3378_s1, %s2884_s30  ;;  %s2372_s22 = sshll.u32 (%p2975_p3), %s596_s18, 2 }
  0x38   : > { %v618_v32 = vld [vmem:[%s602_s21] sm:$0x1] (%p2975_p3)  ;;  %v620_v33 = vld [vmem:[%s602_s21 + $0x2] sm:$0x1] (%p2975_p3)  ;;  %v622_v34 = vld [vmem:[%s602_s21 + $0x4] sm:$0x1] (%p2975_p3) }
  0x39   : > { %v624_v35 = vld [vmem:[%s602_s21 + $0x6] sm:$0x1] (%p2975_p3)  ;;  %s598_s23 = scalar_lea.vmem (%p2975_p3), [#allocation5], %s2372_s22 }
  0x3a   : > { %619 = vst [vmem:[%s598_s23] sm:$0x1] (%p2975_p3), %v618_v32  ;;  %621 = vst [vmem:[%s598_s23 + $0x1] sm:$0x1] (%p2975_p3), %v620_v33 }
  0x3b   : > { %623 = vst [vmem:[%s598_s23 + $0x2] sm:$0x1] (%p2975_p3), %v622_v34  ;;  %625 = vst [vmem:[%s598_s23 + $0x3] sm:$0x1] (%p2975_p3), %v624_v35 }
  0x3d PF: > { %648 = sbr.rel (!%p2975_p3) target bundleno = 81 (0x51), region = 111  ;;  %s650_s24 = sand.u32 (%p2975_p3), 1, %s2876_s28  }
  0x3e   : > { %s2459_s25 = sshll.u32 (%p2975_p3), %s2884_s30, 6  ;;  %s2373_s26 = sshll.u32 (%p2975_p3), %s650_s24, 8 }
  0x3f   : > { %s3091_s14 = scalar_lea.vmem (%p2975_p3), %s3379_s2, %s2459_s25  ;;  %s3096_s18 = scalar_lea.vmem (%p2975_p3), [#allocation6], %s2373_s26 }
  0x40   : > { %v674_v36 = vld [vmem:[%s3091_s14] sm:$0xff] (%p2975_p3)   ;;  %v678_v37 = vld [vmem:[%s3091_s14 + $0x8] sm:$0xff] (%p2975_p3)   ;;  %v682_v38 = vld [vmem:[%s3091_s14 + $0x10] sm:$0xff] (%p2975_p3)  }
  0x41   : > { %675 = vst [vmem:[%s3096_s18] sm:$0xff] (%p2975_p3), %v674_v36   ;;  %679 = vst [vmem:[%s3096_s18 + $0x8] sm:$0xff] (%p2975_p3), %v678_v37   ;;  %v686_v39 = vld [vmem:[%s3091_s14 + $0x18] sm:$0xff] (%p2975_p3)   ;;  %v690_v40 = vld [vmem:[%s3091_s14 + $0x20] sm:$0xff] (%p2975_p3)  }
  0x42   : > { %683 = vst [vmem:[%s3096_s18 + $0x10] sm:$0xff] (%p2975_p3), %v682_v38   ;;  %v694_v41 = vld [vmem:[%s3091_s14 + $0x28] sm:$0xff] (%p2975_p3)   ;;  %687 = vst [vmem:[%s3096_s18 + $0x18] sm:$0xff] (%p2975_p3), %v686_v39   ;;  %v698_v42 = vld [vmem:[%s3091_s14 + $0x30] sm:$0xff] (%p2975_p3)  }
  0x43   : > { %691 = vst [vmem:[%s3096_s18 + $0x20] sm:$0xff] (%p2975_p3), %v690_v40   ;;  %695 = vst [vmem:[%s3096_s18 + $0x28] sm:$0xff] (%p2975_p3), %v694_v41   ;;  %v702_v43 = vld [vmem:[%s3091_s14 + $0x38] sm:$0xff] (%p2975_p3)   ;;  %v706_v44 = vld [vmem:[%s3091_s14 + $0x80] sm:$0xff] (%p2975_p3)  }
  0x44   : > { %699 = vst [vmem:[%s3096_s18 + $0x30] sm:$0xff] %v698_v42   ;;  %703 = vst [vmem:[%s3096_s18 + $0x38] sm:$0xff] %v702_v43   ;;  %v710_v45 = vld [vmem:[%s3091_s14 + $0x88] sm:$0xff]   ;;  %v714_v46 = vld [vmem:[%s3091_s14 + $0x90] sm:$0xff]  }
  0x45   : > { %707 = vst [vmem:[%s3096_s18 + $0x40] sm:$0xff] %v706_v44   ;;  %v718_v47 = vld [vmem:[%s3091_s14 + $0x98] sm:$0xff]   ;;  %711 = vst [vmem:[%s3096_s18 + $0x48] sm:$0xff] %v710_v45   ;;  %v722_v48 = vld [vmem:[%s3091_s14 + $0xa0] sm:$0xff]  }
  0x46   : > { %715 = vst [vmem:[%s3096_s18 + $0x50] sm:$0xff] %v714_v46   ;;  %719 = vst [vmem:[%s3096_s18 + $0x58] sm:$0xff] %v718_v47   ;;  %v726_v49 = vld [vmem:[%s3091_s14 + $0xa8] sm:$0xff]   ;;  %v730_v50 = vld [vmem:[%s3091_s14 + $0xb0] sm:$0xff]  }
  0x47   : > { %723 = vst [vmem:[%s3096_s18 + $0x60] sm:$0xff] %v722_v48   ;;  %727 = vst [vmem:[%s3096_s18 + $0x68] sm:$0xff] %v726_v49   ;;  %v734_v51 = vld [vmem:[%s3091_s14 + $0xb8] sm:$0xff]   ;;  %v738_v52 = vld [vmem:[%s3091_s14 + $0x100] sm:$0xff]  }
  0x48   : > { %731 = vst [vmem:[%s3096_s18 + $0x70] sm:$0xff] %v730_v50   ;;  %v742_v53 = vld [vmem:[%s3091_s14 + $0x108] sm:$0xff]   ;;  %735 = vst [vmem:[%s3096_s18 + $0x78] sm:$0xff] %v734_v51   ;;  %v746_v54 = vld [vmem:[%s3091_s14 + $0x110] sm:$0xff]  }
  0x49   : > { %739 = vst [vmem:[%s3096_s18 + $0x80] sm:$0xff] %v738_v52   ;;  %743 = vst [vmem:[%s3096_s18 + $0x88] sm:$0xff] %v742_v53   ;;  %v750_v55 = vld [vmem:[%s3091_s14 + $0x118] sm:$0xff]   ;;  %v754_v56 = vld [vmem:[%s3091_s14 + $0x120] sm:$0xff]  }
  0x4a   : > { %747 = vst [vmem:[%s3096_s18 + $0x90] sm:$0xff] %v746_v54   ;;  %751 = vst [vmem:[%s3096_s18 + $0x98] sm:$0xff] %v750_v55   ;;  %v758_v57 = vld [vmem:[%s3091_s14 + $0x128] sm:$0xff]   ;;  %v762_v58 = vld [vmem:[%s3091_s14 + $0x130] sm:$0xff]  }
  0x4b   : > { %755 = vst [vmem:[%s3096_s18 + $0xa0] sm:$0xff] %v754_v56   ;;  %v766_v59 = vld [vmem:[%s3091_s14 + $0x138] sm:$0xff]   ;;  %759 = vst [vmem:[%s3096_s18 + $0xa8] sm:$0xff] %v758_v57   ;;  %v770_v60 = vld [vmem:[%s3091_s14 + $0x180] sm:$0xff]  }
  0x4c   : > { %763 = vst [vmem:[%s3096_s18 + $0xb0] sm:$0xff] %v762_v58   ;;  %767 = vst [vmem:[%s3096_s18 + $0xb8] sm:$0xff] %v766_v59   ;;  %v774_v61 = vld [vmem:[%s3091_s14 + $0x188] sm:$0xff]   ;;  %v778_v62 = vld [vmem:[%s3091_s14 + $0x190] sm:$0xff]  }
  0x4d   : > { %771 = vst [vmem:[%s3096_s18 + $0xc0] sm:$0xff] %v770_v60   ;;  %775 = vst [vmem:[%s3096_s18 + $0xc8] sm:$0xff] %v774_v61   ;;  %v782_v63 = vld [vmem:[%s3091_s14 + $0x198] sm:$0xff]   ;;  %v786_v0 = vld [vmem:[%s3091_s14 + $0x1a0] sm:$0xff]  }
  0x4e   : > { %779 = vst [vmem:[%s3096_s18 + $0xd0] sm:$0xff] %v778_v62   ;;  %v790_v1 = vld [vmem:[%s3091_s14 + $0x1a8] sm:$0xff]   ;;  %783 = vst [vmem:[%s3096_s18 + $0xd8] sm:$0xff] %v782_v63   ;;  %v794_v2 = vld [vmem:[%s3091_s14 + $0x1b0] sm:$0xff]  }
  0x4f   : > { %787 = vst [vmem:[%s3096_s18 + $0xe0] sm:$0xff] %v786_v0   ;;  %791 = vst [vmem:[%s3096_s18 + $0xe8] sm:$0xff] %v790_v1   ;;  %v798_v3 = vld [vmem:[%s3091_s14 + $0x1b8] sm:$0xff]  }
  0x50   : > { %795 = vst [vmem:[%s3096_s18 + $0xf0] sm:$0xff] %v794_v2   ;;  %799 = vst [vmem:[%s3096_s18 + $0xf8] sm:$0xff] %v798_v3  }
  0x51 PF: > { %952 = sbr.rel (!%p2975_p3) target bundleno = 88 (0x58), region = 152  ;;  %s954_s19 = sand.u32 (%p2975_p3), 1, %s2876_s28  }
  0x52   : > { %s960_s22 = scalar_lea.vmem (%p2975_p3), %s3380_s3, %s2884_s30  ;;  %s2376_s23 = sshll.u32 (%p2975_p3), %s954_s19, 2 }
  0x53   : > { %v976_v4 = vld [vmem:[%s960_s22] sm:$0x1] (%p2975_p3)  ;;  %v978_v5 = vld [vmem:[%s960_s22 + $0x2] sm:$0x1] (%p2975_p3)  ;;  %v980_v6 = vld [vmem:[%s960_s22 + $0x4] sm:$0x1] (%p2975_p3) }
  0x54   : > { %v982_v7 = vld [vmem:[%s960_s22 + $0x6] sm:$0x1] (%p2975_p3)  ;;  %s956_s24 = scalar_lea.vmem (%p2975_p3), [#allocation7], %s2376_s23 }
  0x55   : > { %977 = vst [vmem:[%s956_s24] sm:$0x1] (%p2975_p3), %v976_v4  ;;  %979 = vst [vmem:[%s956_s24 + $0x1] sm:$0x1] (%p2975_p3), %v978_v5 }
  0x56   : > { %981 = vst [vmem:[%s956_s24 + $0x2] sm:$0x1] (%p2975_p3), %v980_v6  ;;  %983 = vst [vmem:[%s956_s24 + $0x3] sm:$0x1] (%p2975_p3), %v982_v7 }
  0x58 PF: > { %1009 = sbr.rel (%p2983_p7) target bundleno = 1002 (0x3ea), region = 186  ;;  %s1012_s13 = sand.u32 (!%p2983_p7), 1, %s2872_s27  }
  0x59   : > { %s2378_s25 = sshll.u32 (!%p2983_p7), %s1012_s13, 8  ;;  %s2379_s26 = sshll.u32 (!%p2983_p7), %s1012_s13, 2 }
  0x5a   : > { %s3169_s10 = scalar_lea.vmem (!%p2983_p7), [#allocation4], %s2378_s25  ;;  %s3171_s12 = scalar_lea.vmem (!%p2983_p7), [#allocation5], %s2379_s26 }
  0x5b   : > { %s3173_s14 = scalar_lea.vmem (!%p2983_p7), [#allocation6], %s2378_s25  ;;  %s3175_s18 = scalar_lea.vmem (!%p2983_p7), [#allocation7], %s2379_s26 }
  0x5f   : > { %2867 = dma.done.wait (%p2987_p8), [#allocation9], 16  }
  0x60   : > { %2869 = vsyncadd (%p2987_p8), [#allocation9], 4294967280 }
  0x61   : > { %1043 = sfence }
  0x62   : > { %p2383_p3 = scmp.ne.s32.totalorder %s2880_s29, 0 }
  0x63   : > { %vm1097_vm0 = vcmask (!%p2383_p3), 516096   ;;  %v2891_v8 = vmov (!%p2383_p3), 0.0  }
  0x64   : > { %1096 = sbr.rel (%p2383_p3) target bundleno = 107 (0x6b), region = 210  ;;  %1098 = vst.msk [vmem:[#allocation2] sm:$0x1] (!%p2383_p3), %vm1097_vm0, %v2891_v8  ;;  %1099 = vst.msk [vmem:[#allocation2 + $0x1] sm:$0x1] (!%p2383_p3), %vm1097_vm0, %v2891_v8 }
  0x65   : > { %1100 = vst.msk [vmem:[#allocation2 + $0x2] sm:$0x1] (!%p2383_p3), %vm1097_vm0, %v2891_v8  ;;  %1101 = vst.msk [vmem:[#allocation2 + $0x3] sm:$0x1] (!%p2383_p3), %vm1097_vm0, %v2891_v8 }
  0x66   : > { %1102 = vst.msk [vmem:[#allocation3] sm:$0x1] (!%p2383_p3), %vm1097_vm0, %v2891_v8  ;;  %1103 = vst.msk [vmem:[#allocation3 + $0x1] sm:$0x1] (!%p2383_p3), %vm1097_vm0, %v2891_v8 }
  0x67   : > { %1104 = vst.msk [vmem:[#allocation3 + $0x2] sm:$0x1] (!%p2383_p3), %vm1097_vm0, %v2891_v8  ;;  %1105 = vst.msk [vmem:[#allocation3 + $0x3] sm:$0x1] (!%p2383_p3), %vm1097_vm0, %v2891_v8 }
  0x6b PF: > { %v2763_v9 = vld [vmem:[%s3169_s10] sm:$0xff]   ;;  %v2892_v10 = vmov 0.0   ;;  %v2765_v12 = vld [vmem:[%s3169_s10 + $0x8] sm:$0xff]   ;;  %vm2893_vm1 = vmmov 0   ;;  %v2767_v14 = vld [vmem:[%s3169_s10 + $0x10] sm:$0xff]   ;;  %vm1534_vm2 = vcmask 516096  }
  0x6c   : > { %2536 = vmatprep.subr.bf16.mxu0 %v2892_v10  ;;  %2556 = vmatprep.subr.bf16.mxu1 %v2892_v10  ;;  %v2764_v11 = vld [vmem:[%s3169_s10 + $0x40] sm:$0xff]   ;;  %v2766_v13 = vld [vmem:[%s3169_s10 + $0x48] sm:$0xff]   ;;  %v2768_v15 = vld [vmem:[%s3169_s10 + $0x50] sm:$0xff]   ;;  %p2448_p7 = scmp.ne.s32.totalorder %s2880_s29, 1 }
  0x6d   : > { %2537 = vmatpush3.bf16.msra.mxu0 %v2763_v9  ;;  %2552 = vmatprep.mubr.msk.bf16.mxu0 %vm2893_vm1, %v2892_v10  ;;  %v2769_v16 = vld [vmem:[%s3169_s10 + $0x18] sm:$0xff]   ;;  %v2771_v18 = vld [vmem:[%s3169_s10 + $0x20] sm:$0xff]   ;;  %v2773_v20 = vld [vmem:[%s3169_s10 + $0x28] sm:$0xff]   ;;  %vm2025_vm3 = vcmask (!%p2448_p7), 523264   ;;  %s1979_s20 = sld [smem:[#allocation8]] (!%p2448_p7)  ;;  %vm2895_vm4 = vmmov (!%p2448_p7), 0  }
  0x6e   : > { %2557 = vmatpush3.bf16.msra.mxu1 %v2764_v11  ;;  %2538 = vmatprep.subr.bf16.mxu0 %v2892_v10  ;;  %v2770_v17 = vld [vmem:[%s3169_s10 + $0x58] sm:$0xff]   ;;  %v2772_v19 = vld [vmem:[%s3169_s10 + $0x60] sm:$0xff]   ;;  %v2774_v21 = vld [vmem:[%s3169_s10 + $0x68] sm:$0xff]   ;;  %s2449_s29 = sld [smem:[#allocation8 + $0x1]] (!%p2448_p7)  ;;  %vm2212_vm5 = vcmask (!%p2448_p7), 11264  }
  0x6f   : > { %2558 = vmatprep.subr.bf16.mxu1 %v2892_v10  ;;  %2572 = vmatprep.mubr.msk.bf16.mxu1 %vm2893_vm1, %v2892_v10  ;;  %v2775_v22 = vld [vmem:[%s3169_s10 + $0x30] sm:$0xff]   ;;  %v2777_v24 = vld [vmem:[%s3169_s10 + $0x38] sm:$0xff]   ;;  %v1110_v26 = vld [vmem:[%s3171_s12] sm:$0x1] }
  0x70   : > { %v2776_v23 = vld [vmem:[%s3169_s10 + $0x70] sm:$0xff]   ;;  %v2778_v25 = vld [vmem:[%s3169_s10 + $0x78] sm:$0xff]   ;;  %v1111_v27 = vld [vmem:[%s3171_s12 + $0x1] sm:$0x1] }
  0x71   : > { %2539 = vmatpush3.bf16.msra.mxu0 %v2765_v12  ;;  %v2779_v28 = vld [vmem:[%s3169_s10 + $0x80] sm:$0xff]   ;;  %v2781_v30 = vld [vmem:[%s3169_s10 + $0x88] sm:$0xff]   ;;  %v2783_v32 = vld [vmem:[%s3169_s10 + $0x90] sm:$0xff]  }
  0x72   : > { %2559 = vmatpush3.bf16.msra.mxu1 %v2766_v13  ;;  %2540 = vmatprep.subr.bf16.mxu0 %v2892_v10  ;;  %v2780_v29 = vld [vmem:[%s3169_s10 + $0xc0] sm:$0xff]   ;;  %v2782_v31 = vld [vmem:[%s3169_s10 + $0xc8] sm:$0xff]   ;;  %v2784_v33 = vld [vmem:[%s3169_s10 + $0xd0] sm:$0xff]  }
  0x73   : > { %2560 = vmatprep.subr.bf16.mxu1 %v2892_v10  ;;  %v2785_v34 = vld [vmem:[%s3169_s10 + $0x98] sm:$0xff]   ;;  %v2787_v36 = vld [vmem:[%s3169_s10 + $0xa0] sm:$0xff]   ;;  %v2789_v38 = vld [vmem:[%s3169_s10 + $0xa8] sm:$0xff]  }
  0x74   : > { %v2786_v35 = vld [vmem:[%s3169_s10 + $0xd8] sm:$0xff]   ;;  %v2788_v37 = vld [vmem:[%s3169_s10 + $0xe0] sm:$0xff]   ;;  %v2790_v39 = vld [vmem:[%s3169_s10 + $0xe8] sm:$0xff]  }
  0x75   : > { %2541 = vmatpush3.bf16.msra.mxu0 %v2767_v14  ;;  %v2791_v40 = vld [vmem:[%s3169_s10 + $0xb0] sm:$0xff]   ;;  %v2793_v42 = vld [vmem:[%s3169_s10 + $0xb8] sm:$0xff]   ;;  %v1112_v44 = vld [vmem:[%s3171_s12 + $0x2] sm:$0x1] }
  0x76   : > { %2561 = vmatpush3.bf16.msra.mxu1 %v2768_v15  ;;  %2542 = vmatprep.subr.bf16.mxu0 %v2892_v10  ;;  %v2792_v41 = vld [vmem:[%s3169_s10 + $0xf0] sm:$0xff]   ;;  %v2794_v43 = vld [vmem:[%s3169_s10 + $0xf8] sm:$0xff]   ;;  %v1113_v45 = vld [vmem:[%s3171_s12 + $0x3] sm:$0x1] }
  0x77   : > { %2562 = vmatprep.subr.bf16.mxu1 %v2892_v10  ;;  %v2795_v46 = vld [vmem:[%s3173_s14] sm:$0xff]   ;;  %v2797_v48 = vld [vmem:[%s3173_s14 + $0x8] sm:$0xff]   ;;  %v2799_v50 = vld [vmem:[%s3173_s14 + $0x10] sm:$0xff]  }
  0x78   : > { %v2796_v47 = vld [vmem:[%s3173_s14 + $0x40] sm:$0xff]   ;;  %v2798_v49 = vld [vmem:[%s3173_s14 + $0x48] sm:$0xff]   ;;  %v2800_v51 = vld [vmem:[%s3173_s14 + $0x50] sm:$0xff]  }
  0x79   : > { %2543 = vmatpush3.bf16.msra.mxu0 %v2769_v16  ;;  %v2801_v52 = vld [vmem:[%s3173_s14 + $0x18] sm:$0xff]   ;;  %v2803_v54 = vld [vmem:[%s3173_s14 + $0x20] sm:$0xff]   ;;  %v2805_v56 = vld [vmem:[%s3173_s14 + $0x28] sm:$0xff]  }
  0x7a   : > { %2563 = vmatpush3.bf16.msra.mxu1 %v2770_v17  ;;  %2544 = vmatprep.subr.bf16.mxu0 %v2892_v10  ;;  %v2802_v53 = vld [vmem:[%s3173_s14 + $0x58] sm:$0xff]   ;;  %v2804_v55 = vld [vmem:[%s3173_s14 + $0x60] sm:$0xff]   ;;  %v2806_v57 = vld [vmem:[%s3173_s14 + $0x68] sm:$0xff]  }
  0x7b   : > { %2564 = vmatprep.subr.bf16.mxu1 %v2892_v10  ;;  %v2807_v58 = vld [vmem:[%s3173_s14 + $0x30] sm:$0xff]   ;;  %v2809_v60 = vld [vmem:[%s3173_s14 + $0x38] sm:$0xff]   ;;  %v1543_v62 = vld [vmem:[%s3175_s18] sm:$0x1] }
  0x7c   : > { %v2808_v59 = vld [vmem:[%s3173_s14 + $0x70] sm:$0xff]   ;;  %v2810_v61 = vld [vmem:[%s3173_s14 + $0x78] sm:$0xff]   ;;  %v2811_v63 = vld [vmem:[%s3173_s14 + $0x80] sm:$0xff]  }
  0x7d   : > { %2545 = vmatpush3.bf16.msra.mxu0 %v2771_v18  ;;  %v1544_v0 = vld [vmem:[%s3175_s18 + $0x1] sm:$0x1]  ;;  %v2813_v2 = vld [vmem:[%s3173_s14 + $0x88] sm:$0xff]   ;;  %v2815_v4 = vld [vmem:[%s3173_s14 + $0x90] sm:$0xff]  }
  0x7e   : > { %2565 = vmatpush3.bf16.msra.mxu1 %v2772_v19  ;;  %2546 = vmatprep.subr.bf16.mxu0 %v2892_v10  ;;  %v2812_v1 = vld [vmem:[%s3173_s14 + $0xc0] sm:$0xff]   ;;  %v2814_v3 = vld [vmem:[%s3173_s14 + $0xc8] sm:$0xff]   ;;  %v2816_v5 = vld [vmem:[%s3173_s14 + $0xd0] sm:$0xff]  }
  0x7f   : > { %2566 = vmatprep.subr.bf16.mxu1 %v2892_v10  ;;  %v2817_v6 = vld [vmem:[%s3173_s14 + $0x98] sm:$0xff]   ;;  %v2819_v8 = vld [vmem:[%s3173_s14 + $0xa0] sm:$0xff]   ;;  %v2821_v11 = vld [vmem:[%s3173_s14 + $0xa8] sm:$0xff]  }
  0x80   : > { %v2818_v7 = vld [vmem:[%s3173_s14 + $0xd8] sm:$0xff]   ;;  %v2820_v9 = vld [vmem:[%s3173_s14 + $0xe0] sm:$0xff]   ;;  %v2822_v12 = vld [vmem:[%s3173_s14 + $0xe8] sm:$0xff]  }
  0x81   : > { %2547 = vmatpush3.bf16.msra.mxu0 %v2773_v20  ;;  %v2823_v13 = vld [vmem:[%s3173_s14 + $0xb0] sm:$0xff]   ;;  %v2825_v15 = vld [vmem:[%s3173_s14 + $0xb8] sm:$0xff]   ;;  %v1545_v17 = vld [vmem:[%s3175_s18 + $0x2] sm:$0x1] }
  0x82   : > { %2567 = vmatpush3.bf16.msra.mxu1 %v2774_v21  ;;  %2548 = vmatprep.subr.bf16.mxu0 %v2892_v10  ;;  %v2824_v14 = vld [vmem:[%s3173_s14 + $0xf0] sm:$0xff]   ;;  %v2826_v16 = vld [vmem:[%s3173_s14 + $0xf8] sm:$0xff]   ;;  %v1546_v18 = vld [vmem:[%s3175_s18 + $0x3] sm:$0x1] }
  0x83   : > { %2568 = vmatprep.subr.bf16.mxu1 %v2892_v10  ;;  %v1106_v19 = vld [vmem:[#allocation2] sm:$0x1]  ;;  %v1107_v20 = vld [vmem:[#allocation2 + $0x1] sm:$0x1] }
  0x85   : > { %2549 = vmatpush3.bf16.msra.mxu0 %v2775_v22 }
  0x86   : > { %2569 = vmatpush3.bf16.msra.mxu1 %v2776_v23  ;;  %2550 = vmatprep.subr.bf16.mxu0 %v2892_v10 }
  0x87   : > { %2570 = vmatprep.subr.bf16.mxu1 %v2892_v10 }
  0x89   : > { %2551 = vmatpush3.bf16.msra.mxu0 %v2777_v24 }
  0x8a   : > { %2571 = vmatpush3.bf16.msra.mxu1 %v2778_v25  ;;  %2576 = vmatprep.subr.bf16.mxu0 %v2892_v10 }
  0x8b   : > { %2596 = vmatprep.subr.bf16.mxu1 %v2892_v10 }
  0x8c   : > { %2553 = vmatmul.mubr.bf16.vlgmr.msra.gmra.mrb[0].mxu0 %v1110_v26 }
  0x8d   : > { %2573 = vmatmul.mubr.bf16.vlgmr.msra.gmra.mrb[0].mxu1 %v1111_v27  ;;  %2577 = vmatpush3.bf16.msra.mxu0 %v2779_v28 }
  0x8e   : > { %2597 = vmatpush3.bf16.msra.mxu1 %v2780_v29  ;;  %2578 = vmatprep.subr.bf16.mxu0 %v2892_v10 }
  0x8f   : > { %2598 = vmatprep.subr.bf16.mxu1 %v2892_v10  ;;  %2592 = vmatprep.mubr.msk.bf16.mxu0 %vm2893_vm1, %v2892_v10 }
  0x90   : > { %2612 = vmatprep.mubr.msk.bf16.mxu1 %vm2893_vm1, %v2892_v10 }
  0x91   : > { %2579 = vmatpush3.bf16.msra.mxu0 %v2781_v30  ;;  %v1108_v30 = vld [vmem:[#allocation2 + $0x2] sm:$0x1] }
  0x92   : > { %2599 = vmatpush3.bf16.msra.mxu1 %v2782_v31  ;;  %2580 = vmatprep.subr.bf16.mxu0 %v2892_v10  ;;  %v1109_v31 = vld [vmem:[#allocation2 + $0x3] sm:$0x1] }
  0x93   : > { %2600 = vmatprep.subr.bf16.mxu1 %v2892_v10 }
  0x95   : > { %2581 = vmatpush3.bf16.msra.mxu0 %v2783_v32 }
  0x96   : > { %2601 = vmatpush3.bf16.msra.mxu1 %v2784_v33  ;;  %2582 = vmatprep.subr.bf16.mxu0 %v2892_v10 }
  0x97   : > { %2602 = vmatprep.subr.bf16.mxu1 %v2892_v10 }
  0x99   : > { %2583 = vmatpush3.bf16.msra.mxu0 %v2785_v34 }
  0x9a   : > { %2603 = vmatpush3.bf16.msra.mxu1 %v2786_v35  ;;  %2584 = vmatprep.subr.bf16.mxu0 %v2892_v10 }
  0x9b   : > { %2604 = vmatprep.subr.bf16.mxu1 %v2892_v10 }
  0x9d   : > { %2585 = vmatpush3.bf16.msra.mxu0 %v2787_v36 }
  0x9e   : > { %2605 = vmatpush3.bf16.msra.mxu1 %v2788_v37  ;;  %2586 = vmatprep.subr.bf16.mxu0 %v2892_v10 }
  0x9f   : > { %2606 = vmatprep.subr.bf16.mxu1 %v2892_v10 }
  0xa1   : > { %2587 = vmatpush3.bf16.msra.mxu0 %v2789_v38 }
  0xa2   : > { %2607 = vmatpush3.bf16.msra.mxu1 %v2790_v39  ;;  %2588 = vmatprep.subr.bf16.mxu0 %v2892_v10 }
  0xa3   : > { %2608 = vmatprep.subr.bf16.mxu1 %v2892_v10 }
  0xa5   : > { %2589 = vmatpush3.bf16.msra.mxu0 %v2791_v40 }
  0xa6   : > { %2609 = vmatpush3.bf16.msra.mxu1 %v2792_v41  ;;  %2590 = vmatprep.subr.bf16.mxu0 %v2892_v10 }
  0xa7   : > { %2610 = vmatprep.subr.bf16.mxu1 %v2892_v10 }
  0xa9   : > { %2591 = vmatpush3.bf16.msra.mxu0 %v2793_v42  ;;  %v1539_v42 = vld [vmem:[#allocation3] sm:$0x1] }
  0xaa   : > { %2611 = vmatpush3.bf16.msra.mxu1 %v2794_v43  ;;  %2616 = vmatprep.subr.bf16.mxu0 %v2892_v10  ;;  %v1540_v43 = vld [vmem:[#allocation3 + $0x1] sm:$0x1] }
  0xab   : > { %2636 = vmatprep.subr.bf16.mxu1 %v2892_v10 }
  0xac   : > { %2593 = vmatmul.mubr.bf16.vlgmr.msra.gmra.mrb[4].mxu0 %v1112_v44 }
  0xad   : > { %2613 = vmatmul.mubr.bf16.vlgmr.msra.gmra.mrb[4].mxu1 %v1113_v45  ;;  %2617 = vmatpush3.bf16.msra.mxu0 %v2795_v46 }
  0xae   : > { %2637 = vmatpush3.bf16.msra.mxu1 %v2796_v47  ;;  %2618 = vmatprep.subr.bf16.mxu0 %v2892_v10 }
  0xaf   : > { %2638 = vmatprep.subr.bf16.mxu1 %v2892_v10  ;;  %2632 = vmatprep.mubr.msk.bf16.mxu0 %vm2893_vm1, %v2892_v10 }
  0xb0   : > { %2652 = vmatprep.mubr.msk.bf16.mxu1 %vm2893_vm1, %v2892_v10 }
  0xb1   : > { %2619 = vmatpush3.bf16.msra.mxu0 %v2797_v48 }
  0xb2   : > { %2639 = vmatpush3.bf16.msra.mxu1 %v2798_v49  ;;  %2620 = vmatprep.subr.bf16.mxu0 %v2892_v10 }
  0xb3   : > { %2640 = vmatprep.subr.bf16.mxu1 %v2892_v10 }
  0xb5   : > { %2621 = vmatpush3.bf16.msra.mxu0 %v2799_v50 }
  0xb6   : > { %2641 = vmatpush3.bf16.msra.mxu1 %v2800_v51  ;;  %2622 = vmatprep.subr.bf16.mxu0 %v2892_v10 }
  0xb7   : > { %2642 = vmatprep.subr.bf16.mxu1 %v2892_v10 }
  0xb9   : > { %2623 = vmatpush3.bf16.msra.mxu0 %v2801_v52 }
  0xba   : > { %2643 = vmatpush3.bf16.msra.mxu1 %v2802_v53  ;;  %2624 = vmatprep.subr.bf16.mxu0 %v2892_v10 }
  0xbb   : > { %2644 = vmatprep.subr.bf16.mxu1 %v2892_v10 }
  0xbd   : > { %2625 = vmatpush3.bf16.msra.mxu0 %v2803_v54  ;;  %v1541_v54 = vld [vmem:[#allocation3 + $0x2] sm:$0x1] }
  0xbe   : > { %2645 = vmatpush3.bf16.msra.mxu1 %v2804_v55  ;;  %2626 = vmatprep.subr.bf16.mxu0 %v2892_v10  ;;  %v1542_v55 = vld [vmem:[#allocation3 + $0x3] sm:$0x1] }
  0xbf   : > { %2646 = vmatprep.subr.bf16.mxu1 %v2892_v10 }
  0xc1   : > { %2627 = vmatpush3.bf16.msra.mxu0 %v2805_v56 }
  0xc2   : > { %2647 = vmatpush3.bf16.msra.mxu1 %v2806_v57  ;;  %2628 = vmatprep.subr.bf16.mxu0 %v2892_v10 }
  0xc3   : > { %2648 = vmatprep.subr.bf16.mxu1 %v2892_v10 }
  0xc5   : > { %2629 = vmatpush3.bf16.msra.mxu0 %v2807_v58 }
  0xc6   : > { %2649 = vmatpush3.bf16.msra.mxu1 %v2808_v59  ;;  %2630 = vmatprep.subr.bf16.mxu0 %v2892_v10 }
  0xc7   : > { %2650 = vmatprep.subr.bf16.mxu1 %v2892_v10 }
  0xc9   : > { %2631 = vmatpush3.bf16.msra.mxu0 %v2809_v60 }
  0xca   : > { %2651 = vmatpush3.bf16.msra.mxu1 %v2810_v61  ;;  %2656 = vmatprep.subr.bf16.mxu0 %v2892_v10 }
  0xcb   : > { %2676 = vmatprep.subr.bf16.mxu1 %v2892_v10 }
  0xcc   : > { %2633 = vmatmul.mubr.bf16.vlgmr.msra.gmra.mrb[8].mxu0 %v1543_v62 }
  0xcd   : > { %2653 = vmatmul.mubr.bf16.vlgmr.msra.gmra.mrb[8].mxu1 %v1544_v0  ;;  %2657 = vmatpush3.bf16.msra.mxu0 %v2811_v63 }
  0xce   : > { %2677 = vmatpush3.bf16.msra.mxu1 %v2812_v1  ;;  %2658 = vmatprep.subr.bf16.mxu0 %v2892_v10 }
  0xcf   : > { %2678 = vmatprep.subr.bf16.mxu1 %v2892_v10  ;;  %2672 = vmatprep.mubr.msk.bf16.mxu0 %vm2893_vm1, %v2892_v10 }
  0xd0   : > { %2692 = vmatprep.mubr.msk.bf16.mxu1 %vm2893_vm1, %v2892_v10 }
  0xd1   : > { %2659 = vmatpush3.bf16.msra.mxu0 %v2813_v2  ;;  %v1996_v2 = vld [vmem:[%s3382_s5] sm:$0x3] (!%p2448_p7) }
  0xd2   : > { %2679 = vmatpush3.bf16.msra.mxu1 %v2814_v3  ;;  %2660 = vmatprep.subr.bf16.mxu0 %v2892_v10  ;;  %v1995_v3 = vld [vmem:[%s3381_s4] sm:$0x3] (!%p2448_p7) }
  0xd3   : > { %2680 = vmatprep.subr.bf16.mxu1 %v2892_v10 }
  0xd5   : > { %2661 = vmatpush3.bf16.msra.mxu0 %v2815_v4  ;;  %v2006_v4 = vlaneseq (!%p2448_p7) }
  0xd6   : > { %2681 = vmatpush3.bf16.msra.mxu1 %v2816_v5  ;;  %2662 = vmatprep.subr.bf16.mxu0 %v2892_v10  ;;  %v2894_v5 = vmov (!%p2448_p7), 0.0  }
  0xd7   : > { %2682 = vmatprep.subr.bf16.mxu1 %v2892_v10 }
  0xd9   : > { %2663 = vmatpush3.bf16.msra.mxu0 %v2817_v6  ;;  %v2896_v6 = vmov (!%p2448_p7), 1966171168  }
  0xda   : > { %2683 = vmatpush3.bf16.msra.mxu1 %v2818_v7  ;;  %2664 = vmatprep.subr.bf16.mxu0 %v2892_v10  ;;  %v2004_v7 = vunpack.c.l.s4 (!%p2448_p7), %v2896_v6 }
  0xdb   : > { %2684 = vmatprep.subr.bf16.mxu1 %v2892_v10 }
  0xdd   : > { %2665 = vmatpush3.bf16.msra.mxu0 %v2819_v8  ;;  %v2007_v8 = vshrl.u32 (!%p2448_p7), %v2006_v4, 7 }
  0xde   : > { %2685 = vmatpush3.bf16.msra.mxu1 %v2820_v9  ;;  %2666 = vmatprep.subr.bf16.mxu0 %v2892_v10 }
  0xdf   : > { %2686 = vmatprep.subr.bf16.mxu1 %v2892_v10 }
  0xe1   : > { %2667 = vmatpush3.bf16.msra.mxu0 %v2821_v11 }
  0xe2   : > { %2687 = vmatpush3.bf16.msra.mxu1 %v2822_v12  ;;  %2668 = vmatprep.subr.bf16.mxu0 %v2892_v10 }
  0xe3   : > { %2688 = vmatprep.subr.bf16.mxu1 %v2892_v10 }
  0xe5   : > { %2669 = vmatpush3.bf16.msra.mxu0 %v2823_v13 }
  0xe6   : > { %2689 = vmatpush3.bf16.msra.mxu1 %v2824_v14  ;;  %2670 = vmatprep.subr.bf16.mxu0 %v2892_v10  ;;  %v2005_v14 = vunpack.c.0.s8 (!%p2448_p7), %v2004_v7 }
  0xe7   : > { %2690 = vmatprep.subr.bf16.mxu1 %v2892_v10 }
  0xe9   : > { %2671 = vmatpush3.bf16.msra.mxu0 %v2825_v15  ;;  %v1980_v15 = vstv (!%p2448_p7), %s1979_s20 }
  0xea   : > { %2691 = vmatpush3.bf16.msra.mxu1 %v2826_v16  ;;  %2696 = vmatprep.subr.mxu0 (!%p2448_p7), %v2894_v5  ;;  %v2008_v16 = vsub.s32 (!%p2448_p7), %v2005_v14, %v2007_v8 }
  0xeb   : > { %2701 = vmatprep.subr.mxu1 (!%p2448_p7), %v2894_v5 }
  0xec   : > { %2673 = vmatmul.mubr.bf16.vlgmr.msra.gmra.mrb[12].mxu0 %v1545_v17 }
  0xed   : > { %2693 = vmatmul.mubr.bf16.vlgmr.msra.gmra.mrb[12].mxu1 %v1546_v18  ;;  %2698 = vmatprep.mubr.msk.f32.mxu0 (!%p2448_p7), %vm2895_vm4, %v2894_v5 }
  0xee   : > { %2703 = vmatprep.mubr.msk.f32.mxu1 (!%p2448_p7), %vm2895_vm4, %v2894_v5 }
  0xf2   : > { %2697 = vmatpush3.xpose.msk.msra.mxu0 (!%p2448_p7), %vm2025_vm3, %v1996_v2 }
  0xf3   : > { %2702 = vmatpush3.xpose.msk.msra.mxu1 (!%p2448_p7), %vm2025_vm3, %v1995_v3 }
 0x15f   : > { %v1260_v21 = vpop.f32.mrb[0].mxu0 }
 0x160   : > { %v1530_v22 = vadd.f32 %v1260_v21, %v1106_v19  ;;  %v1348_v23 = vpop.f32.mrb[0].mxu1  ;;  %v2554_v24 = vpop.f32.mrb[1].mxu0 }
 0x161   : > { %v1531_v25 = vadd.f32 %v1348_v23, %v1107_v20  ;;  %v2574_v26 = vpop.f32.mrb[1].mxu1  ;;  %v1263_v27 = vpop.f32.mrb[2].mxu0 }
 0x162   : > { %1535 = vst.msk [vmem:[#allocation2] sm:$0x1] %vm1534_vm2, %v1530_v22  ;;  %v1351_v28 = vpop.f32.mrb[2].mxu1  ;;  %v2555_v10 = vpop.f32.mrb[3].mxu0  ;;  %v1990_v27 = vstv (!%p2448_p7), %s2449_s29 }
 0x163   : > { %1536 = vst.msk [vmem:[#allocation2 + $0x1] sm:$0x1] %vm1534_vm2, %v1531_v25  ;;  %v2575_v29 = vpop.f32.mrb[3].mxu1 }
 0x169   : > { %v1975_v9 = vld [vmem:[#allocation2] sm:$0x1] (!%p2448_p7) }
 0x16a   : > { %v1976_v11 = vld [vmem:[#allocation2 + $0x1] sm:$0x1] (!%p2448_p7)  ;;  %v1981_v18 = vmul.f32 (!%p2448_p7), %v1980_v15, %v1975_v9 }
 0x16b   : > { %v1982_v19 = vmul.f32 (!%p2448_p7), %v1980_v15, %v1976_v11 }
 0x16d   : > { %v2001_v25 = vcombine.low (!%p2448_p7), %v1981_v18, %v1982_v19 }
 0x17f   : > { %v1436_v32 = vpop.f32.mrb[4].mxu0 }
 0x180   : > { %v1532_v33 = vadd.f32 %v1436_v32, %v1108_v30  ;;  %v1524_v34 = vpop.f32.mrb[4].mxu1  ;;  %v2594_v35 = vpop.f32.mrb[5].mxu0 }
 0x181   : > { %v1533_v36 = vadd.f32 %v1524_v34, %v1109_v31  ;;  %v2614_v37 = vpop.f32.mrb[5].mxu1  ;;  %v1439_v38 = vpop.f32.mrb[6].mxu0  ;;  %v2009_v31 = vrot.slane (!%p2448_p7), %v2001_v25, %v2008_v16 }
 0x182   : > { %1537 = vst.msk [vmem:[#allocation2 + $0x2] sm:$0x1] %vm1534_vm2, %v1532_v33  ;;  %v1527_v39 = vpop.f32.mrb[6].mxu1  ;;  %v2595_v40 = vpop.f32.mrb[7].mxu0 }
 0x183   : > { %1538 = vst.msk [vmem:[#allocation2 + $0x3] sm:$0x1] %vm1534_vm2, %v1533_v36  ;;  %v2615_v41 = vpop.f32.mrb[7].mxu1 }
 0x189   : > { %v1977_v12 = vld [vmem:[#allocation2 + $0x2] sm:$0x1] (!%p2448_p7) }
 0x18a   : > { %v1978_v13 = vld [vmem:[#allocation2 + $0x3] sm:$0x1] (!%p2448_p7)  ;;  %v1983_v20 = vmul.f32 (!%p2448_p7), %v1980_v15, %v1977_v12 }
 0x18b   : > { %v1984_v21 = vmul.f32 (!%p2448_p7), %v1980_v15, %v1978_v13 }
 0x18d   : > { %v2002_v26 = vcombine.low (!%p2448_p7), %v1983_v20, %v1984_v21 }
 0x18f   : > { %v2016_v32 = vrot.slane (!%p2448_p7), %v2002_v26, %v2008_v16 }
 0x191   : > { %v2017_v35 = vcombine.low (!%p2448_p7), %v2009_v31, %v2016_v32 }
 0x193   : > { %v2024_v38 = vrot.slane (!%p2448_p7), %v2017_v35, %v2008_v16 }
 0x195   : > { %2699 = vmatmul.mubr.msk.f32.vlgmr.msra.gmra.mrb[0].mxu0 (!%p2448_p7), %vm2025_vm3, %v2024_v38 }
 0x19f   : > { %v1693_v44 = vpop.f32.mrb[8].mxu0 }
 0x1a0   : > { %v1963_v45 = vadd.f32 %v1693_v44, %v1539_v42  ;;  %v1781_v46 = vpop.f32.mrb[8].mxu1  ;;  %v2634_v47 = vpop.f32.mrb[9].mxu0  ;;  %v2454_v44 = vld [vmem:[%s3383_s6] ss:$0 sm:$0xff] (!%p2448_p7) }
 0x1a1   : > { %v1964_v48 = vadd.f32 %v1781_v46, %v1540_v43  ;;  %v2654_v49 = vpop.f32.mrb[9].mxu1  ;;  %v1696_v50 = vpop.f32.mrb[10].mxu0 }
 0x1a2   : > { %1967 = vst.msk [vmem:[#allocation3] sm:$0x1] %vm1534_vm2, %v1963_v45  ;;  %v1784_v51 = vpop.f32.mrb[10].mxu1  ;;  %v2635_v52 = vpop.f32.mrb[11].mxu0 }
 0x1a3   : > { %1968 = vst.msk [vmem:[#allocation3 + $0x1] sm:$0x1] %vm1534_vm2, %v1964_v48  ;;  %v2655_v53 = vpop.f32.mrb[11].mxu1 }
 0x1a9   : > { %v1985_v17 = vld [vmem:[#allocation3] sm:$0x1] (!%p2448_p7) }
 0x1aa   : > { %v1986_v22 = vld [vmem:[#allocation3 + $0x1] sm:$0x1] (!%p2448_p7)  ;;  %v1991_v28 = vmul.f32 (!%p2448_p7), %v1990_v27, %v1985_v17 }
 0x1ab   : > { %v1992_v10 = vmul.f32 (!%p2448_p7), %v1990_v27, %v1986_v22 }
 0x1ad   : > { %v2105_v33 = vcombine.low (!%p2448_p7), %v1991_v28, %v1992_v10 }
 0x1af   : > { %v2113_v36 = vrot.slane (!%p2448_p7), %v2105_v33, %v2008_v16 }
 0x1bd   : > { %1974 = sbr.rel (%p2448_p7) target bundleno = 1002 (0x3ea), region = 214 }
 0x1bf   : > { %v1869_v56 = vpop.f32.mrb[12].mxu0 }
 0x1c0   : > { %v1965_v57 = vadd.f32 %v1869_v56, %v1541_v54  ;;  %v1957_v58 = vpop.f32.mrb[12].mxu1  ;;  %v2674_v59 = vpop.f32.mrb[13].mxu0 }
 0x1c1   : > { %v1966_v60 = vadd.f32 %v1957_v58, %v1542_v55  ;;  %v2694_v61 = vpop.f32.mrb[13].mxu1  ;;  %v1872_v62 = vpop.f32.mrb[14].mxu0 }
 0x1c2   : > { %1969 = vst.msk [vmem:[#allocation3 + $0x2] sm:$0x1] %vm1534_vm2, %v1965_v57  ;;  %v1960_v63 = vpop.f32.mrb[14].mxu1  ;;  %v2675_v0 = vpop.f32.mrb[15].mxu0 }
 0x1c3   : > { %1970 = vst.msk [vmem:[#allocation3 + $0x3] sm:$0x1] %vm1534_vm2, %v1966_v60  ;;  %v2695_v1 = vpop.f32.mrb[15].mxu1 }
 0x1c9   : > { %v1987_v23 = vld [vmem:[#allocation3 + $0x2] sm:$0x1] }
 0x1ca   : > { %v1988_v24 = vld [vmem:[#allocation3 + $0x3] sm:$0x1]  ;;  %v1993_v29 = vmul.f32 %v1990_v27, %v1987_v23 }
 0x1cb   : > { %v1994_v30 = vmul.f32 %v1990_v27, %v1988_v24 }
 0x1cd   : > { %v2106_v34 = vcombine.low %v1993_v29, %v1994_v30 }
 0x1cf   : > { %v2120_v37 = vrot.slane %v2106_v34, %v2008_v16 }
 0x1d1   : > { %v2121_v39 = vcombine.low %v2113_v36, %v2120_v37 }
 0x1d3   : > { %v2128_v40 = vrot.slane %v2121_v39, %v2008_v16 }
 0x1d5   : > { %2704 = vmatmul.mubr.msk.f32.vlgmr.msra.gmra.mrb[0].mxu1 %vm2025_vm3, %v2128_v40 }
 0x268   : > { %v2097_v41 = vpop.f32.mrb[0].mxu0 }
 0x269   : > { %v2700_v42 = vpop.f32.mrb[1].mxu0 }
 0x2a8   : > { %v2200_v43 = vpop.f32.mrb[0].mxu1 }
 0x2a9   : > { %v2201_v45 = vadd.f32 %v2200_v43, %v2097_v41  ;;  %v2705_v46 = vpop.f32.mrb[1].mxu1 }
 0x2ab   : > { %v2211_v47 = vadd.f32 %v2454_v44, %v2201_v45 }
 0x2ad   : > { %v2213_v48 = vsel %vm2212_vm5, %v2211_v47, -inf }
 0x2ae   : > { %2214 = vmax.xlane.f32.xlu0 %v2213_v48 }
 0x33b   : > { %v2215_v49 = vpop.xlane.xlu0 %2214 }
 0x33c   : > { %v2216_v50 = vsub.f32 %v2211_v47, %v2215_v49 }
 0x33e   : > { %v2217_v51 = vmul.f32 1.442695, %v2216_v50 }
 0x340   : > { %2827 = vpow2.f32 %v2217_v51 }
 0x34a   : > { %v2828_v52 = vpop.eup %2827 }
 0x34b   : > { %v2219_v53 = vsel %vm2212_vm5, %v2828_v52, 0.0 }
 0x34c   : > { %2220 = vadd.xlane.f32.xlu0 %v2219_v53 }
 0x3d9   : > { %v2221_v54 = vpop.xlane.xlu0 %2220 }
 0x3da   : > { %2829 = vlog2.f32 %v2221_v54 }
 0x3e4   : > { %v2830_v55 = vpop.eup %2829 }
 0x3e5   : > { %v2223_v56 = vmul.f32 0.6931472, %v2830_v55 }
 0x3e7   : > { %v2224_v57 = vsub.f32 %v2216_v50, %v2223_v56 }
 0x3e9   : > { %2225 = vst.msk [vmem:[%s3385_s8] sm:$0xf] %vm2212_vm5, %v2224_v57 }
 0x3ea PF: > { %s19_s9 = sadd.s32 1, %s2888_s9   ;;  %s3389_s27 = smov %s2876_s28 }
 0x3eb   : > { %p16_p8 = scmp.ge.s32.totalorder %s19_s9, 4   ;;  %s3390_s28 = smov %s2992_s17 }
 0x3ec   : > { %s3391_s29 = smov %s2884_s30  ;;  %s3392_s30 = smov %s3394_s11 }
 0x3ed   :  { %18 = sbr.rel (!%p16_p8) target bundleno = 3 (0x3), region = 274 }
 0x3f4   :  { %2245 = vsyncpa [#allocation9], 1 }
 0x3f5   :  { %2247 = vsyncpa [#allocation9 + $0x1], 1 }

</bundles_post_ra>
